<compile_context>
chip_gen: v7x
topology: tpu7x:2x2x1
jax: 0.10.0
libtpu: 0.0.40
codegen_flags: <defaults>
</compile_context>

<pallas_src>
import math

import jax
import jax.numpy as jnp
from jax.experimental import pallas as pl
from jax.experimental.pallas import tpu as pltpu


def _crf_kernel(x_ref, ws_ref, bs_ref, wt_ref, bt_ref, os_ref, ot_ref):
    """One row-tile of the state / transition projections.

    x_ref  : (TM, D)    input rows (streamed, double-buffered)
    ws_ref : (D, NL)    state weight   (grid-invariant)
    bs_ref : (1, NL)    state bias     (grid-invariant)
    wt_ref : (D, NL2)   trans weight   (grid-invariant)
    bt_ref : (1, NL2)   trans bias     (grid-invariant)
    os_ref : (TM, NL)   state scores
    ot_ref : (TM, NL2)  transition scores
    """
    x = x_ref[...]
    os_ref[...] = (
        jnp.dot(x, ws_ref[...], preferred_element_type=jnp.float32) + bs_ref[...]
    )
    ot_ref[...] = (
        jnp.dot(x, wt_ref[...], preferred_element_type=jnp.float32) + bt_ref[...]
    )


def _vmem_budget_bytes():
    """Generation-aware VMEM budget: ~75% of physical per-core VMEM
    (v5e/v6e: 128 MiB -> ~96 MiB; v7x: 64 MiB -> ~48 MiB)."""
    vmem = 128 << 20
    try:
        info = pltpu.get_tpu_info()
        vmem = int(getattr(info, "vmem_capacity_bytes", vmem) or vmem)
    except Exception:
        # Hardware query unavailable (e.g. interpret/emulation); keep default.
        pass
    return (vmem * 3) // 4


def prepare_chain_crf_params(w_state, b_state, w_trans, b_trans):
    """One-time parameter prep (call OUTSIDE the per-step forward).

    Converts PyTorch-layout parameters ([out, in] weights, [out] biases) into
    kernel-ready layout so the forward never rebuilds / pads / transposes the
    weights in HBM on every call.
    """
    w_state_t = jnp.asarray(w_state, jnp.float32).T          # [D, NL]
    b_state2 = jnp.asarray(b_state, jnp.float32).reshape(1, -1)
    w_trans_t = jnp.asarray(w_trans, jnp.float32).T          # [D, NL*NL]
    b_trans2 = jnp.asarray(b_trans, jnp.float32).reshape(1, -1)
    return w_state_t, b_state2, w_trans_t, b_trans2


def chain_crf_forward(x, params, *, row_tile=512):
    """Pallas implementation of ChainCRF.forward (bigram=True).

    x      : [B, L, D] float32
    params : output of prepare_chain_crf_params
    Returns (out_s [B, L, NL, 1], out_t [B, L, NL, NL]).
    """
    w_state_t, b_state2, w_trans_t, b_trans2 = params
    B, L, D = x.shape
    NL = w_state_t.shape[1]
    NL2 = w_trans_t.shape[1]
    N = NL + NL2
    M = B * L
    xf = x.reshape(M, D)

    # --- VMEM budgeting (weights/biases are grid-invariant but double-buffered
    # by the default pipeline, so charge them 2x; shrink row_tile only if the
    # streamed tiles blow the generation-aware budget).
    budget = _vmem_budget_bytes()
    w_bytes = (D * N + N) * 4                       # resident weights + biases
    def vmem_needed(tm):
        io_bytes = 2 * tm * (D + N) * 4             # double-buffered x / out tiles
        return 2 * w_bytes + io_bytes
    row_tile = max(8, (row_tile // 8) * 8)
    while row_tile > 8 and vmem_needed(row_tile) > budget:
        row_tile //= 2
    # Give both TensorCores work on v7x megacore: at least 2 row-grid steps.
    while row_tile > 8 and pl.cdiv(M, row_tile) < 2:
        row_tile //= 2
    vmem_limit = int(min(max(vmem_needed(row_tile) + (4 << 20), 32 << 20), budget))

    grid = (pl.cdiv(M, row_tile),)   # uneven last tile is masked by Pallas

    out_s_flat, out_t_flat = pl.pallas_call(
        _crf_kernel,
        out_shape=(
            jax.ShapeDtypeStruct((M, NL), jnp.float32),
            jax.ShapeDtypeStruct((M, NL2), jnp.float32),
        ),
        grid_spec=pltpu.PrefetchScalarGridSpec(
            num_scalar_prefetch=0,
            grid=grid,
            in_specs=[
                pl.BlockSpec((row_tile, D), lambda i: (i, 0)),   # x rows (streamed)
                pl.BlockSpec((D, NL), lambda i: (0, 0)),          # state weight
                pl.BlockSpec((1, NL), lambda i: (0, 0)),          # state bias
                pl.BlockSpec((D, NL2), lambda i: (0, 0)),         # trans weight
                pl.BlockSpec((1, NL2), lambda i: (0, 0)),         # trans bias
            ],
            out_specs=[
                pl.BlockSpec((row_tile, NL), lambda i: (i, 0)),
                pl.BlockSpec((row_tile, NL2), lambda i: (i, 0)),
            ],
        ),
        compiler_params=pltpu.CompilerParams(
            dimension_semantics=("parallel",),   # row axis shards across TCs
            vmem_limit_bytes=vmem_limit,
        ),
        cost_estimate=pl.CostEstimate(
            flops=2 * M * D * N,
            transcendentals=0,
            bytes_accessed=4 * (M * D + D * N + N + M * N),
        ),
    )(xf, w_state_t, b_state2, w_trans_t, b_trans2)

    out_s = out_s_flat.reshape(B, L, NL, 1)      # matches .unsqueeze(-1)
    out_t = out_t_flat.reshape(B, L, NL, NL)     # matches .view(B, L, NL, NL)
    return out_s, out_t


def init_chain_crf_params(key, input_size, num_labels_arg):
    """Deterministic parameter init mirroring ChainCRF.reset_parameters (bigram=True).

    Returns PyTorch-layout parameters ([out, in] weights, [out] biases)."""
    NL = num_labels_arg + 1  # extra pad label
    k1, k2 = jax.random.split(key)

    # state_nn: default torch.nn.Linear weight init (bound = 1/sqrt(fan_in)),
    # bias explicitly reset to 0 by reset_parameters.
    bound_s = 1.0 / math.sqrt(input_size)
    w_state = jax.random.uniform(
        k1, (NL, input_size), jnp.float32, minval=-bound_s, maxval=bound_s
    )
    b_state = jnp.zeros((NL,), jnp.float32)

    # trans_nn: xavier_uniform weight, zero bias.
    fan_in, fan_out = input_size, NL * NL
    bound_t = math.sqrt(6.0 / (fan_in + fan_out))
    w_trans = jax.random.uniform(
        k2, (NL * NL, input_size), jnp.float32, minval=-bound_t, maxval=bound_t
    )
    b_trans = jnp.zeros((NL * NL,), jnp.float32)

    return w_state, b_state, w_trans, b_trans, NL


if __name__ == "__main__":
    # Small, deterministic example shapes consistent with the module's forward:
    # input = [batch_size, length, input_size]
    batch_size, length, input_size = 2, 8, 32
    num_labels_arg = 4  # module uses num_labels + 1 = 5 internally

    key = jax.random.PRNGKey(0)
    k_x, k_p = jax.random.split(key)

    x = jax.random.normal(k_x, (batch_size, length, input_size), jnp.float32)
    w_state, b_state, w_trans, b_trans, NL = init_chain_crf_params(
        k_p, input_size, num_labels_arg
    )

    # One-time param prep (kept out of the per-call forward path).
    params = prepare_chain_crf_params(w_state, b_state, w_trans, b_trans)

    out_s, out_t = chain_crf_forward(x, params)
    out_s = jax.block_until_ready(out_s)
    out_t = jax.block_until_ready(out_t)

    # Pure-JAX reference check (same math, no Pallas).
    ref_s = (x @ w_state.T + b_state)[..., :, None]
    ref_t = (x @ w_trans.T + b_trans).reshape(batch_size, length, NL, NL)

    assert out_s.shape == (batch_size, length, NL, 1), out_s.shape
    assert out_t.shape == (batch_size, length, NL, NL), out_t.shape
    assert jnp.allclose(out_s, ref_s, atol=1e-4, rtol=1e-4)
    assert jnp.allclose(out_t, ref_t, atol=1e-4, rtol=1e-4)

    print("KERNEL_OK")
</pallas_src>

<mosaic_0001>
module attributes {stable_mosaic.version = 11 : i64} {
  func.func @_crf_kernel(%arg0: i32, %arg1: memref<8x32xf32, #tpu.memory_space<vmem>>, %arg2: memref<32x5xf32, #tpu.memory_space<vmem>>, %arg3: memref<1x5xf32, #tpu.memory_space<vmem>>, %arg4: memref<32x25xf32, #tpu.memory_space<vmem>>, %arg5: memref<1x25xf32, #tpu.memory_space<vmem>>, %arg6: memref<8x5xf32, #tpu.memory_space<vmem>>, %arg7: memref<8x25xf32, #tpu.memory_space<vmem>>) attributes {dimension_semantics = [#tpu.dimension_semantics<parallel>], iteration_bounds = array<i64: 2>, scalar_prefetch = 0 : i64, scratch_operands = 0 : i64, tpu.core_type = #tpu.core_type<tc>, window_params = [{transform_indices = @transform_0, window_bounds = array<i64: 8, 32>}, {pipeline_mode = #tpu.pipeline_mode<synchronous>, transform_indices = @transform_1, window_bounds = array<i64: 32, 5>}, {pipeline_mode = #tpu.pipeline_mode<synchronous>, transform_indices = @transform_2, window_bounds = array<i64: 1, 5>}, {pipeline_mode = #tpu.pipeline_mode<synchronous>, transform_indices = @transform_3, window_bounds = array<i64: 32, 25>}, {pipeline_mode = #tpu.pipeline_mode<synchronous>, transform_indices = @transform_4, window_bounds = array<i64: 1, 25>}, {transform_indices = @transform_5, window_bounds = array<i64: 8, 5>}, {transform_indices = @transform_6, window_bounds = array<i64: 8, 25>}]} {
    %c0 = arith.constant 0 : index
    %c0_0 = arith.constant 0 : index
    %0 = vector.load %arg1[%c0, %c0_0] : memref<8x32xf32, #tpu.memory_space<vmem>>, vector<8x32xf32>
    %c0_1 = arith.constant 0 : index
    %c0_2 = arith.constant 0 : index
    %1 = vector.load %arg2[%c0_1, %c0_2] : memref<32x5xf32, #tpu.memory_space<vmem>>, vector<32x5xf32>
    %cst = arith.constant dense<0.000000e+00> : vector<8x5xf32>
    %2 = tpu.matmul %0, %1, %cst {dimension_numbers = #tpu.dot_dimension_numbers<[1], [0], [0], [1], [0, 0, 1, 1], [], []>} : vector<8x32xf32>, vector<32x5xf32>, vector<8x5xf32> -> vector<8x5xf32>
    %c0_3 = arith.constant 0 : index
    %c0_4 = arith.constant 0 : index
    %3 = vector.load %arg3[%c0_3, %c0_4] : memref<1x5xf32, #tpu.memory_space<vmem>>, vector<1x5xf32>
    %4 = vector.broadcast %3 : vector<1x5xf32> to vector<8x5xf32>
    %5 = arith.addf %2, %4 : vector<8x5xf32>
    %c0_5 = arith.constant 0 : index
    %c0_6 = arith.constant 0 : index
    %6 = vector.load %arg6[%c0_5, %c0_6] : memref<8x5xf32, #tpu.memory_space<vmem>>, vector<8x5xf32>
    tpu.vector_store %arg6[%c0_5, %c0_6], %5 {strides = array<i32>} : memref<8x5xf32, #tpu.memory_space<vmem>>, vector<8x5xf32>,
    %c0_7 = arith.constant 0 : index
    %c0_8 = arith.constant 0 : index
    %7 = vector.load %arg4[%c0_7, %c0_8] : memref<32x25xf32, #tpu.memory_space<vmem>>, vector<32x25xf32>
    %cst_9 = arith.constant dense<0.000000e+00> : vector<8x25xf32>
    %8 = tpu.matmul %0, %7, %cst_9 {dimension_numbers = #tpu.dot_dimension_numbers<[1], [0], [0], [1], [0, 0, 1, 1], [], []>} : vector<8x32xf32>, vector<32x25xf32>, vector<8x25xf32> -> vector<8x25xf32>
    %c0_10 = arith.constant 0 : index
    %c0_11 = arith.constant 0 : index
    %9 = vector.load %arg5[%c0_10, %c0_11] : memref<1x25xf32, #tpu.memory_space<vmem>>, vector<1x25xf32>
    %10 = vector.broadcast %9 : vector<1x25xf32> to vector<8x25xf32>
    %11 = arith.addf %8, %10 : vector<8x25xf32>
    %c0_12 = arith.constant 0 : index
    %c0_13 = arith.constant 0 : index
    %12 = vector.load %arg7[%c0_12, %c0_13] : memref<8x25xf32, #tpu.memory_space<vmem>>, vector<8x25xf32>
    tpu.vector_store %arg7[%c0_12, %c0_13], %11 {strides = array<i32>} : memref<8x25xf32, #tpu.memory_space<vmem>>, vector<8x25xf32>,
    return
  }
  func.func @transform_0(%arg0: i32) -> (i32, i32) {
    %c0_i32 = arith.constant 0 : i32
    %c0_i32_0 = arith.constant 0 : i32
    return %arg0, %c0_i32 : i32, i32
  }
  func.func @transform_1(%arg0: i32) -> (i32, i32) {
    %c0_i32 = arith.constant 0 : i32
    %c0_i32_0 = arith.constant 0 : i32
    %c0_i32_1 = arith.constant 0 : i32
    return %c0_i32, %c0_i32_0 : i32, i32
  }
  func.func @transform_2(%arg0: i32) -> (i32, i32) {
    %c0_i32 = arith.constant 0 : i32
    %c0_i32_0 = arith.constant 0 : i32
    %c0_i32_1 = arith.constant 0 : i32
    return %c0_i32, %c0_i32_0 : i32, i32
  }
  func.func @transform_3(%arg0: i32) -> (i32, i32) {
    %c0_i32 = arith.constant 0 : i32
    %c0_i32_0 = arith.constant 0 : i32
    %c0_i32_1 = arith.constant 0 : i32
    return %c0_i32, %c0_i32_0 : i32, i32
  }
  func.func @transform_4(%arg0: i32) -> (i32, i32) {
    %c0_i32 = arith.constant 0 : i32
    %c0_i32_0 = arith.constant 0 : i32
    %c0_i32_1 = arith.constant 0 : i32
    return %c0_i32, %c0_i32_0 : i32, i32
  }
  func.func @transform_5(%arg0: i32) -> (i32, i32) {
    %c0_i32 = arith.constant 0 : i32
    %c0_i32_0 = arith.constant 0 : i32
    return %arg0, %c0_i32 : i32, i32
  }
  func.func @transform_6(%arg0: i32) -> (i32, i32) {
    %c0_i32 = arith.constant 0 : i32
    %c0_i32_0 = arith.constant 0 : i32
    return %arg0, %c0_i32 : i32, i32
  }
}

</mosaic_0001>

<bundles_post_ra>
// kernel: tpu_custom_call.1
= control target key start
LH: loop header
LB: loop body
LE: loop exit
PB: predicated region body
PF: predicated region fallthrough
CT: control target
= control target key end

     0   :  { %12 = vsyncpa [#allocation3], 0  ;;  %s870_s0 = inlined_call_operand.vmem [shape: f32[16,32], index: 0, kind: input, shape index: {}]   ;;  %s871_s1 = inlined_call_operand.vmem [shape: f32[32,5], index: 1, kind: input, shape index: {}]   ;;  %s872_s2 = inlined_call_operand.vmem [shape: f32[1,5], index: 2, kind: input, shape index: {}]   ;;  %s873_s3 = inlined_call_operand.vmem [shape: f32[32,25], index: 3, kind: input, shape index: {}]   ;;  %s874_s4 = inlined_call_operand.vmem [shape: f32[1,25], index: 4, kind: input, shape index: {}]   ;;  %s875_s5 = inlined_call_operand.vmem [shape: f32[16,5], index: 5, kind: output, shape index: {0}]   ;;  %s876_s6 = inlined_call_operand.hbm [shape: f32[16,25], index: 6, kind: output, shape index: {1}]  }
   0x1   :  { %14 = vsyncpa [#allocation3 + $0x1], 0  ;;  %s737_s21 = smov 0   ;;  %s739_s22 = smov 0  }
   0x2   :  { %s741_s23 = smov 0   ;;  %s743_s24 = smov 0  }
   0x3 LB: > { %s758_s25 = sadd.s32 4294967295, %s696_s24   ;;  %s533_s26 = sadd.s32 4294967294, %s696_s24   ;;  %s696_s24 = sphi %s743_s24, %s882_s24   ;;  %s692_s23 = sphi %s741_s23, %s881_s23   ;;  %s688_s22 = sphi %s739_s22, %s880_s22   ;;  %s684_s21 = sphi %s737_s21, %s879_s21  }
   0x4   : > { %s762_s27 = sadd.s32 1, %s696_s24   ;;  %s163_s28 = sadd.s32 1, %s692_s23 }
   0x5   : > { %s160_s29 = ssub.s32 %s696_s24, %s762_s27  ;;  %p173_p0 = scmp.ne.s32.totalorder %s692_s23, %s688_s22 }
   0x6   : > { %p161_p1 = scmp.eq.s32.totalorder %s160_s29, 0  ;;  %p174_p2 = scmp.eq.s32.totalorder %s758_s25, 1 }
   0x7   : > { %p179_p3 = scmp.ne.s32.totalorder %s688_s22, %s684_s21  ;;  %p180_p4 = scmp.eq.s32.totalorder %s533_s26, 1 }
   0x8   : > { %s773_s30 = scalar_select %p161_p1, %s692_s23, %s163_s28  }
   0x9   : > { %p775_p5 = por %p174_p2, %p173_p0  ;;  %p779_p6 = por %p180_p4, %p179_p3 }
   0xa   : > { %p536_p7 = scmp.ge.s32.totalorder %s696_s24, 1  ;;  %p217_p8 = scmp.lt.s32.totalorder %s696_s24, 3 }
   0xc   : > { %p218_p9 = pnand %p536_p7, %p217_p8 }
   0xd   : > { %v259_v0 = vld [vmem:[%s871_s1] sm:$0xff] (!%p218_p9)  ;;  %v260_v1 = vld [vmem:[%s871_s1 + $0x8] sm:$0xff] (!%p218_p9)  ;;  %v698_v3 = vmov (!%p218_p9), 0.0|0.0   ;;  %v261_v6 = vld [vmem:[%s871_s1 + $0x10] sm:$0xff] (!%p218_p9)  ;;  %p250_p10 = scmp.lt.s32.totalorder (!%p218_p9), %s758_s25, 1  ;;  %vm699_vm0 = vmmov (!%p218_p9), 0  }
   0xe   : > { %221 = sbr.rel (%p218_p9) target bundleno = 255 (0xff), region = 40  ;;  %v346_v2 = vld [vmem:[%s873_s3] sm:$0xff] (!%p218_p9)  ;;  %580 = vmatprep.subr.bf16.mxu0 (!%p218_p9), %v698_v3  ;;  %586 = vmatprep.subr.bf16.mxu1 (!%p218_p9), %v698_v3  ;;  %v581_v4 = vpack.c.bf16 (!%p218_p9), %v260_v1, %v259_v0  ;;  %v347_v5 = vld [vmem:[%s873_s3 + $0x8] sm:$0xff] (!%p218_p9)  ;;  %v262_v7 = vld [vmem:[%s871_s1 + $0x18] sm:$0xff] (!%p218_p9)  ;;  %v700_v11 = vmov (!%p218_p9), 0.0   ;;  %vm270_vm1 = vcmask (!%p218_p9), 261120  }
   0xf   : > { %v587_v8 = vpack.c.bf16 (!%p218_p9), %v347_v5, %v346_v2  ;;  %v348_v9 = vld [vmem:[%s873_s3 + $0x10] sm:$0xff] (!%p218_p9)  ;;  %v349_v10 = vld [vmem:[%s873_s3 + $0x18] sm:$0xff] (!%p218_p9)  ;;  %566 = vmatprep.mubr.msk.f32.mxu0 (!%p218_p9), %vm699_vm0, %v700_v11  ;;  %577 = vmatprep.mubr.msk.f32.mxu1 (!%p218_p9), %vm699_vm0, %v700_v11  ;;  %v584_v12 = vpack.c.bf16 (!%p218_p9), %v262_v7, %v261_v6  ;;  %s247_s15 = sand.u32 (!%p218_p9), 1, %s688_s22   ;;  %v540_v15 = vld [vmem:[%s872_s2] ss:$0 sm:$0xff] (!%p218_p9)  ;;  %s545_s26 = sshll.u32 (!%p218_p9), %s758_s25, 7 }
  0x10   : > { %582 = vmatpush3.bf16.msra.mxu0 (!%p218_p9), %v581_v4  ;;  %v590_v13 = vpack.c.bf16 (!%p218_p9), %v349_v10, %v348_v9  ;;  %s537_s16 = sshll.u32 (!%p218_p9), %s247_s15, 3  ;;  %v542_v16 = vld [vmem:[%s874_s4] ss:$0 sm:$0xff] (!%p218_p9)  ;;  %vm344_vm2 = vcmask (!%p218_p9), 39936   ;;  %vm427_vm3 = vcmask (!%p218_p9), 203776   ;;  %s828_s17 = scalar_lea.hbm (!%p218_p9), %s876_s6, %s545_s26 }
  0x11   : > { %588 = vmatpush3.bf16.msra.mxu1 (!%p218_p9), %v587_v8  ;;  %583 = vmatprep.subr.bf16.mxu0 (!%p218_p9), %v698_v3  ;;  %s249_s28 = scalar_lea.vmem (!%p218_p9), [#allocation2], %s537_s16  ;;  %s701_s16 = smov (!%p218_p9), [#allocation2]  }
  0x12   : > { %589 = vmatprep.subr.bf16.mxu1 (!%p218_p9), %v698_v3  ;;  %s450_s29 = sshll.u32 (!%p218_p9), %s249_s28, 4  ;;  %s638_s18 = sshll.u32 (!%p218_p9), %s701_s16, 4  ;;  %s830_s29 = int_to_ptr.vmem [resolvable:$true] %s450_s29  ;;  %s639_s18 = int_to_ptr.vmem [resolvable:$false] %s638_s18 }
  0x13   : > { %s640_s19 = scalar_lea.vmem (!%p218_p9), %s639_s18, 256  ;;  %p641_p0 = scmp.lt.s32.totalorder (!%p218_p9), %s830_s29, %s639_s18 }
  0x14   : > { %585 = vmatpush3.bf16.msra.mxu0 (!%p218_p9), %v584_v12 }
  0x15   : > { %s251_s10 = scalar_select %p250_p10, %s758_s25, 1  ;;  %591 = vmatpush3.bf16.msra.mxu1 %v590_v13 }
  0x16   : > { %s434_s25 = scalar_lea.sflag [#allocation3], %s247_s15 }
  0x17   : > { %s538_s11 = sshll.u32 %s251_s10, 3 }
  0x18   : > { %s253_s14 = scalar_lea.vmem %s870_s0, %s538_s11  ;;  %s257_s12 = scalar_lea.vmem %s875_s5, %s538_s11 }
  0x19   : > { %v258_v14 = vld [vmem:[%s253_s14] sm:$0xff]  ;;  %s634_s11 = scalar_lea.vmem %s830_s29, 128 }
  0x1a   : > { %567 = vmatmul.mubr.msk.f32.vlgmr.msra.gmra.mrb[0].mxu0 %vm270_vm1, %v258_v14  ;;  %578 = vmatmul.mubr.msk.f32.vlgmr.msra.gmra.mrb[0].mxu1 %vm270_vm1, %v258_v14  ;;  %p635_p11 = scmp.ne.s32.totalorder %s830_s29, %s634_s11  ;;  %p642_p1 = scmp.lt.s32.totalorder %s640_s19, %s634_s11 }
  0x1c   : > { %p636_p12 = pnand %p635_p11, %p775_p5  ;;  %p643_p2 = por %p642_p1, %p641_p0 }
  0x1e   : > { %p637_p13 = pneg %p636_p12 }
  0x20   : > { %p644_p3 = pnand %p643_p2, %p637_p13 }
  0xed   : > { %v340_v17 = vpop.f32.mrb[0].mxu0  ;;  %v423_v19 = vpop.f32.mrb[0].mxu1 }
  0xee   : > { %v341_v18 = vadd.f32 %v540_v15, %v340_v17  ;;  %v568_v20 = vpop.f32.mrb[1].mxu0  ;;  %v424_v21 = vadd.f32 %v542_v16, %v423_v19  ;;  %v579_v22 = vpop.f32.mrb[1].mxu1 }
  0xf0   : > { %345 = vst.msk [vmem:[%s257_s12] sm:$0xff] %vm344_vm2, %v341_v18 }
  0xf1   : > { %428 = vst.msk [vmem:[%s249_s28] sm:$0xff] %vm427_vm3, %v424_v21 }
  0xf2   : > { %647 = shalt.err (!%p644_p3)
}
  0xf3   : > { %s648_s15 = scalar_lea.hbm %s828_s17, 128  ;;  %s652_s28 = scalar_lea.hbm %s876_s6, 256 }
  0xf4   : > { %p649_p4 = scmp.ne.s32.totalorder %s828_s17, %s648_s15  ;;  %p653_p9 = scmp.lt.u32.totalorder %s828_s17, %s876_s6 }
  0xf5   : > { %p654_p10 = scmp.lt.u32.totalorder %s652_s28, %s648_s15  ;;  %p656_p12 = scmp.lt.u32.totalorder %s648_s15, %s828_s17 }
  0xf6   : > { %p650_p7 = pnand %p649_p4, %p775_p5 }
  0xf7   : > { %p655_p11 = por %p654_p10, %p653_p9 }
  0xf8   : > { %p651_p8 = pneg %p650_p7 }
  0xf9   : > { %p657_p13 = por %p656_p12, %p655_p11 }
  0xfb   : > { %p658_p0 = pnand %p657_p13, %p651_p8 }
  0xfd   : > { %661 = shalt.err (!%p658_p0)
}
  0xfe   : > { %592 = dma.vmem_to_hbm [thread:$0]  (%p775_p5), %s830_s29, 128, %s828_s17, %s434_s25  }
  0xff PF: > { %p598_p1 = scmp.ge.s32.totalorder %s696_s24, 2  ;;  %s469_s12 = sand.u32 1, %s684_s21  }
 0x100   : > { %s470_s13 = scalar_lea.sflag [#allocation3], %s469_s12 }
 0x101   : > { %p595_p2 = pnand %p598_p1, %p779_p6 }
 0x103   : > { %679 = dma.done.wait (!%p595_p2), %s470_s13, 128  }
 0x104   : > { %681 = vsyncadd (!%p595_p2), %s470_s13, 4294967168  ;;  %p17_p3 = scmp.ge.s32.totalorder %s762_s27, 4   ;;  %s879_s21 = smov %s688_s22 }
 0x105   : > { %s880_s22 = smov %s692_s23  ;;  %s881_s23 = smov %s773_s30 }
 0x106   : > { %s882_s24 = smov %s762_s27  ;;  %19 = sbr.rel (!%p17_p3) target bundleno = 3 (0x3), region = 87 }
 0x10d   :  { %475 = vsyncpa [#allocation3], 1 }
 0x10e   :  { %477 = vsyncpa [#allocation3 + $0x1], 1 }

</bundles_post_ra>
